<compile_context>
chip_gen: v7x
topology: tpu7x:2x2x1
jax: 0.10.0
libtpu: 0.0.40
codegen_flags: <defaults>
</compile_context>

<pallas_src>
import functools

import jax
import jax.numpy as jnp
from jax.experimental import pallas as pl
from jax.experimental.pallas import tpu as pltpu

LEAKY_SLOPE = 0.01   # torch.nn.LeakyReLU() default negative_slope
BN_EPS = 1e-5        # nn.BatchNorm2d default eps


# ---------------------------------------------------------------------------
# Pass 1: conv (single im2col contraction) + bias + LeakyReLU + per-image
#         BN partial statistics.  One grid step per image ("parallel").
# ---------------------------------------------------------------------------
def _conv_lrelu_stats_kernel(*refs, K, W, Ho, Wo, stride):
    if stride > 1:
        x_ref, w_ref, b_ref, r_ref, y_ref, stats_ref, xs_ref = refs
    else:
        x_ref, w_ref, b_ref, y_ref, stats_ref, xs_ref = refs
        r_ref = None

    cin = x_ref.shape[1]
    cout = w_ref.shape[0]
    # Dense (stride-1 layout) columns needed so that every tap read stays
    # strictly inside the (Cin, H*W) slab (max index == H*W - 1).
    lacc = (Ho - 1) * stride * W + (Wo - 1) * stride + 1
    row_len = (Wo - 1) * stride + 1

    # ---- im2col staged in VMEM: K*K lane-shifted views stacked on sublanes.
    for kh in range(K):
        for kw in range(K):
            t = kh * K + kw
            xs_ref[pl.ds(t * cin, cin), :] = x_ref[0, :, pl.ds(kh * W + kw, lacc)]

    # ---- ONE MXU contraction over the full K*K*Cin depth, f32 accumulation.
    acc = jnp.dot(w_ref[...], xs_ref[...], preferred_element_type=jnp.float32)

    # ---- bias + LeakyReLU in f32 on the VPU (wrap columns are never stored).
    acc = acc + b_ref[...]
    acc = jnp.where(acc > 0, acc, LEAKY_SLOPE * acc)

    # ---- compact dense columns q = ho*stride*W + wo*stride  ->  p = ho*Wo+wo.
    #      Crop and stride handling are fused here; only valid conv outputs are
    #      stored and counted, so no post-kernel XLA slice is needed and the
    #      BN statistics need no validity mask.
    y_sum = jnp.zeros((cout, 1), jnp.float32)
    y_ssq = jnp.zeros((cout, 1), jnp.float32)
    for ho in range(Ho):
        start = ho * stride * W
        seg = acc[:, start:start + row_len]                # (Cout, row_len)
        if stride > 1:
            # exact 0/1 selection picks every stride-th column of the row
            seg = jnp.dot(seg, r_ref[...], preferred_element_type=jnp.float32)
        y_ref[0, :, pl.ds(ho * Wo, Wo)] = seg.astype(y_ref.dtype)
        y_sum = y_sum + jnp.sum(seg, axis=1, keepdims=True)
        y_ssq = y_ssq + jnp.sum(seg * seg, axis=1, keepdims=True)

    # Per-image partial statistics (combined across the batch in pass 2).
    # TODO(synk): E[x^2]-E[x]^2 in f32 can cancel for huge counts; a Welford
    #             combine would be more robust at scale.
    stats_ref[0, :, 0:1] = y_sum
    stats_ref[0, :, 1:2] = y_ssq


# ---------------------------------------------------------------------------
# Pass 2: N-way stats reduction + BatchNorm apply (training-mode batch stats).
# ---------------------------------------------------------------------------
def _bn_apply_kernel(y_ref, stats_ref, g_ref, bt_ref, o_ref, *, inv_count):
    s = jnp.sum(stats_ref[...], axis=0)                    # (Cout, 2) over batch
    mean = s[:, 0:1] * inv_count
    var = s[:, 1:2] * inv_count - mean * mean              # biased variance
    scale = g_ref[...] * jax.lax.rsqrt(var + BN_EPS)
    shift = bt_ref[...] - mean * scale
    y = y_ref[0, :, :].astype(jnp.float32)                 # f32 VPU math
    o_ref[0, :, :] = (y * scale + shift).astype(o_ref.dtype)


# ---------------------------------------------------------------------------
# Wrapper
# ---------------------------------------------------------------------------
def _vmem_limit_bytes(*block_bytes):
    est = 2 * sum(int(b) for b in block_bytes)   # double-buffered pipeline blocks
    return int(min(max(4 * est, 16 * 2**20), 100 * 2**20))


@functools.partial(jax.jit, static_argnames=("stride", "compute_dtype"))
def conv_block_forward(x_nchw, w_oihw, bias, gamma, beta, *, stride=1,
                       compute_dtype=jnp.float32):
    N, Cin, H, W = x_nchw.shape
    Cout, Cin2, KH, KW = w_oihw.shape
    assert KH == KW and Cin2 == Cin, "square kernels / matching channels only"
    assert stride >= 1
    K = KH
    Ho = (H - K) // stride + 1
    Wo = (W - K) // stride + 1
    Lc = Ho * Wo
    Lacc = (Ho - 1) * stride * W + (Wo - 1) * stride + 1
    row_len = (Wo - 1) * stride + 1
    itemsize = jnp.dtype(compute_dtype).itemsize

    # Lane-dense image slab (Cin on sublanes, H*W on lanes).  Reshape of
    # contiguous NCHW is free: no wrapper-side transpose or pad of x.
    x_slab = x_nchw.reshape(N, Cin, H * W).astype(compute_dtype)

    # Fused im2col weight: w2[co, (kh*K + kw)*Cin + ci] = w[co, ci, kh, kw]
    w2 = jnp.transpose(w_oihw, (0, 2, 3, 1)).reshape(Cout, K * K * Cin)
    w2 = w2.astype(compute_dtype)
    b2 = bias.reshape(Cout, 1).astype(jnp.float32)
    g2 = gamma.reshape(Cout, 1).astype(jnp.float32)
    bt2 = beta.reshape(Cout, 1).astype(jnp.float32)

    # ---- pass 1: conv + bias + LeakyReLU + per-image BN partial stats -------
    kern1 = functools.partial(_conv_lrelu_stats_kernel,
                              K=K, W=W, Ho=Ho, Wo=Wo, stride=stride)
    in_arrays = [x_slab, w2, b2]
    in_specs = [
        pl.BlockSpec((1, Cin, H * W), lambda n: (n, 0, 0)),
        pl.BlockSpec((Cout, K * K * Cin), lambda n: (0, 0)),
        pl.BlockSpec((Cout, 1), lambda n: (0, 0)),
    ]
    if stride > 1:
        # Tiny (row_len, Wo) 0/1 matrix selecting every stride-th column.
        r_sel = jnp.zeros((row_len, Wo), jnp.float32)
        r_sel = r_sel.at[jnp.arange(Wo) * stride, jnp.arange(Wo)].set(1.0)
        in_arrays.append(r_sel)
        in_specs.append(pl.BlockSpec((row_len, Wo), lambda n: (0, 0)))

    vmem1 = _vmem_limit_bytes(
        Cin * H * W * itemsize,            # x block
        Cout * K * K * Cin * itemsize,     # weights
        Cout * Lc * itemsize,              # y block
        K * K * Cin * Lacc * itemsize,     # im2col scratch
        Cout * Lacc * 4,                   # dense accumulator value
    )
    y_inter, stats = pl.pallas_call(
        kern1,
        grid=(N,),
        in_specs=in_specs,
        out_specs=[
            pl.BlockSpec((1, Cout, Lc), lambda n: (n, 0, 0)),
            pl.BlockSpec((1, Cout, 2), lambda n: (n, 0, 0)),
        ],
        out_shape=(jax.ShapeDtypeStruct((N, Cout, Lc), compute_dtype),
                   jax.ShapeDtypeStruct((N, Cout, 2), jnp.float32)),
        scratch_shapes=[pltpu.VMEM((K * K * Cin, Lacc), compute_dtype)],
        compiler_params=pltpu.CompilerParams(
            dimension_semantics=("parallel",),   # no cross-image dependency
            vmem_limit_bytes=vmem1),
    )(*in_arrays)

    # ---- pass 2: combine per-image stats + BN apply, per-image tiles --------
    inv_count = 1.0 / float(N * Lc)
    kern2 = functools.partial(_bn_apply_kernel, inv_count=inv_count)
    vmem2 = _vmem_limit_bytes(Cout * Lc * itemsize, Cout * Lc * 4,
                              N * Cout * 2 * 4)
    out_flat = pl.pallas_call(
        kern2,
        grid=(N,),
        in_specs=[
            pl.BlockSpec((1, Cout, Lc), lambda n: (n, 0, 0)),
            pl.BlockSpec((N, Cout, 2), lambda n: (0, 0, 0)),
            pl.BlockSpec((Cout, 1), lambda n: (0, 0)),
            pl.BlockSpec((Cout, 1), lambda n: (0, 0)),
        ],
        out_specs=pl.BlockSpec((1, Cout, Lc), lambda n: (n, 0, 0)),
        out_shape=jax.ShapeDtypeStruct((N, Cout, Lc), jnp.float32),
        compiler_params=pltpu.CompilerParams(
            dimension_semantics=("parallel",),
            vmem_limit_bytes=vmem2),
    )(y_inter, stats, g2, bt2)

    # Output is already compact channel-major: the final reshape is free.
    return out_flat.reshape(N, Cout, Ho, Wo)


# ---------------------------------------------------------------------------
# Pure-JAX reference (correctness check)
# ---------------------------------------------------------------------------
def _reference(x, w, b, gamma, beta, stride):
    y = jax.lax.conv_general_dilated(
        x, w, (stride, stride), "VALID",
        dimension_numbers=("NCHW", "OIHW", "NCHW"))
    y = y + b.reshape(1, -1, 1, 1)
    y = jnp.where(y > 0, y, LEAKY_SLOPE * y)
    mean = jnp.mean(y, axis=(0, 2, 3), keepdims=True)
    var = jnp.mean(jnp.square(y - mean), axis=(0, 2, 3), keepdims=True)
    return ((y - mean) * jax.lax.rsqrt(var + BN_EPS)
            * gamma.reshape(1, -1, 1, 1) + beta.reshape(1, -1, 1, 1))


if __name__ == "__main__":
    # Shapes consistent with Conv_Block(in_channels=4, out_channels=8, kernel_size=3)
    N, Cin, H, W = 2, 4, 16, 16
    Cout, K, stride = 8, 3, 1

    key = jax.random.PRNGKey(0)
    kx, kw_, kb, kg, kbt = jax.random.split(key, 5)
    x = jax.random.normal(kx, (N, Cin, H, W), dtype=jnp.float32)
    w = jax.random.normal(kw_, (Cout, Cin, K, K), dtype=jnp.float32) * 0.1
    b = jax.random.normal(kb, (Cout,), dtype=jnp.float32) * 0.1
    gamma = 1.0 + 0.1 * jax.random.normal(kg, (Cout,), dtype=jnp.float32)
    beta = 0.1 * jax.random.normal(kbt, (Cout,), dtype=jnp.float32)

    ref = _reference(x, w, b, gamma, beta, stride)

    # f32 path (exact PyTorch numerics).
    out = jax.block_until_ready(
        conv_block_forward(x, w, b, gamma, beta, stride=stride))
    assert out.shape == ref.shape, (out.shape, ref.shape)
    err = float(jnp.max(jnp.abs(out - ref)))
    assert err < 3e-4, err

    # bf16-operand / bf16-intermediate, f32-accumulate path
    # (v6e / v7x HBM-traffic optimization from the perf review).
    out_bf16 = jax.block_until_ready(
        conv_block_forward(x, w, b, gamma, beta, stride=stride,
                           compute_dtype=jnp.bfloat16))
    assert out_bf16.shape == ref.shape, (out_bf16.shape, ref.shape)
    err_bf16 = float(jnp.max(jnp.abs(out_bf16 - ref)))
    assert err_bf16 < 7e-2, err_bf16

    print("KERNEL_OK")
</pallas_src>

<mosaic_0001>
module attributes {stable_mosaic.version = 11 : i64} {
  func.func @_conv_lrelu_stats_kernel(%arg0: i32, %arg1: memref<1x4x256xf32, #tpu.memory_space<vmem>>, %arg2: memref<8x36xf32, #tpu.memory_space<vmem>>, %arg3: memref<8x1xf32, #tpu.memory_space<vmem>>, %arg4: memref<1x8x196xf32, #tpu.memory_space<vmem>>, %arg5: memref<1x8x2xf32, #tpu.memory_space<vmem>>, %arg6: memref<36x222xf32, #tpu.memory_space<vmem>>) attributes {dimension_semantics = [#tpu.dimension_semantics<parallel>], iteration_bounds = array<i64: 2>, scalar_prefetch = 0 : i64, scratch_operands = 1 : i64, tpu.core_type = #tpu.core_type<tc>, window_params = [{transform_indices = @transform_0, window_bounds = array<i64: 1, 4, 256>}, {pipeline_mode = #tpu.pipeline_mode<synchronous>, transform_indices = @transform_1, window_bounds = array<i64: 8, 36>}, {pipeline_mode = #tpu.pipeline_mode<synchronous>, transform_indices = @transform_2, window_bounds = array<i64: 8, 1>}, {transform_indices = @transform_3, window_bounds = array<i64: 1, 8, 196>}, {transform_indices = @transform_4, window_bounds = array<i64: 1, 8, 2>}]} {
    %c0 = arith.constant 0 : index
    %c0_0 = arith.constant 0 : index
    %c0_1 = arith.constant 0 : index
    %0 = vector.load %arg1[%c0, %c0_0, %c0_1] : memref<1x4x256xf32, #tpu.memory_space<vmem>>, vector<1x4x222xf32>
    %1 = vector.shape_cast %0 : vector<1x4x222xf32> to vector<4x222xf32>
    %c0_2 = arith.constant 0 : index
    %c0_3 = arith.constant 0 : index
    %2 = vector.load %arg6[%c0_2, %c0_3] : memref<36x222xf32, #tpu.memory_space<vmem>>, vector<4x222xf32>
    tpu.vector_store %arg6[%c0_2, %c0_3], %1 {strides = array<i32>} : memref<36x222xf32, #tpu.memory_space<vmem>>, vector<4x222xf32>,
    %c0_4 = arith.constant 0 : index
    %c0_5 = arith.constant 0 : index
    %c1 = arith.constant 1 : index
    %3 = vector.load %arg1[%c0_4, %c0_5, %c1] : memref<1x4x256xf32, #tpu.memory_space<vmem>>, vector<1x4x222xf32>
    %4 = vector.shape_cast %3 : vector<1x4x222xf32> to vector<4x222xf32>
    %c4 = arith.constant 4 : index
    %c0_6 = arith.constant 0 : index
    %5 = vector.load %arg6[%c4, %c0_6] : memref<36x222xf32, #tpu.memory_space<vmem>>, vector<4x222xf32>
    tpu.vector_store %arg6[%c4, %c0_6], %4 {strides = array<i32>} : memref<36x222xf32, #tpu.memory_space<vmem>>, vector<4x222xf32>,
    %c0_7 = arith.constant 0 : index
    %c0_8 = arith.constant 0 : index
    %c2 = arith.constant 2 : index
    %6 = vector.load %arg1[%c0_7, %c0_8, %c2] : memref<1x4x256xf32, #tpu.memory_space<vmem>>, vector<1x4x222xf32>
    %7 = vector.shape_cast %6 : vector<1x4x222xf32> to vector<4x222xf32>
    %c8 = arith.constant 8 : index
    %c0_9 = arith.constant 0 : index
    %8 = vector.load %arg6[%c8, %c0_9] : memref<36x222xf32, #tpu.memory_space<vmem>>, vector<4x222xf32>
    tpu.vector_store %arg6[%c8, %c0_9], %7 {strides = array<i32>} : memref<36x222xf32, #tpu.memory_space<vmem>>, vector<4x222xf32>,
    %c0_10 = arith.constant 0 : index
    %c0_11 = arith.constant 0 : index
    %c16 = arith.constant 16 : index
    %9 = vector.load %arg1[%c0_10, %c0_11, %c16] : memref<1x4x256xf32, #tpu.memory_space<vmem>>, vector<1x4x222xf32>
    %10 = vector.shape_cast %9 : vector<1x4x222xf32> to vector<4x222xf32>
    %c12 = arith.constant 12 : index
    %c0_12 = arith.constant 0 : index
    %11 = vector.load %arg6[%c12, %c0_12] : memref<36x222xf32, #tpu.memory_space<vmem>>, vector<4x222xf32>
    tpu.vector_store %arg6[%c12, %c0_12], %10 {strides = array<i32>} : memref<36x222xf32, #tpu.memory_space<vmem>>, vector<4x222xf32>,
    %c0_13 = arith.constant 0 : index
    %c0_14 = arith.constant 0 : index
    %c17 = arith.constant 17 : index
    %12 = vector.load %arg1[%c0_13, %c0_14, %c17] : memref<1x4x256xf32, #tpu.memory_space<vmem>>, vector<1x4x222xf32>
    %13 = vector.shape_cast %12 : vector<1x4x222xf32> to vector<4x222xf32>
    %c16_15 = arith.constant 16 : index
    %c0_16 = arith.constant 0 : index
    %14 = vector.load %arg6[%c16_15, %c0_16] : memref<36x222xf32, #tpu.memory_space<vmem>>, vector<4x222xf32>
    tpu.vector_store %arg6[%c16_15, %c0_16], %13 {strides = array<i32>} : memref<36x222xf32, #tpu.memory_space<vmem>>, vector<4x222xf32>,
    %c0_17 = arith.constant 0 : index
    %c0_18 = arith.constant 0 : index
    %c18 = arith.constant 18 : index
    %15 = vector.load %arg1[%c0_17, %c0_18, %c18] : memref<1x4x256xf32, #tpu.memory_space<vmem>>, vector<1x4x222xf32>
    %16 = vector.shape_cast %15 : vector<1x4x222xf32> to vector<4x222xf32>
    %c20 = arith.constant 20 : index
    %c0_19 = arith.constant 0 : index
    %17 = vector.load %arg6[%c20, %c0_19] : memref<36x222xf32, #tpu.memory_space<vmem>>, vector<4x222xf32>
    tpu.vector_store %arg6[%c20, %c0_19], %16 {strides = array<i32>} : memref<36x222xf32, #tpu.memory_space<vmem>>, vector<4x222xf32>,
    %c0_20 = arith.constant 0 : index
    %c0_21 = arith.constant 0 : index
    %c32 = arith.constant 32 : index
    %18 = vector.load %arg1[%c0_20, %c0_21, %c32] : memref<1x4x256xf32, #tpu.memory_space<vmem>>, vector<1x4x222xf32>
    %19 = vector.shape_cast %18 : vector<1x4x222xf32> to vector<4x222xf32>
    %c24 = arith.constant 24 : index
    %c0_22 = arith.constant 0 : index
    %20 = vector.load %arg6[%c24, %c0_22] : memref<36x222xf32, #tpu.memory_space<vmem>>, vector<4x222xf32>
    tpu.vector_store %arg6[%c24, %c0_22], %19 {strides = array<i32>} : memref<36x222xf32, #tpu.memory_space<vmem>>, vector<4x222xf32>,
    %c0_23 = arith.constant 0 : index
    %c0_24 = arith.constant 0 : index
    %c33 = arith.constant 33 : index
    %21 = vector.load %arg1[%c0_23, %c0_24, %c33] : memref<1x4x256xf32, #tpu.memory_space<vmem>>, vector<1x4x222xf32>
    %22 = vector.shape_cast %21 : vector<1x4x222xf32> to vector<4x222xf32>
    %c28 = arith.constant 28 : index
    %c0_25 = arith.constant 0 : index
    %23 = vector.load %arg6[%c28, %c0_25] : memref<36x222xf32, #tpu.memory_space<vmem>>, vector<4x222xf32>
    tpu.vector_store %arg6[%c28, %c0_25], %22 {strides = array<i32>} : memref<36x222xf32, #tpu.memory_space<vmem>>, vector<4x222xf32>,
    %c0_26 = arith.constant 0 : index
    %c0_27 = arith.constant 0 : index
    %c34 = arith.constant 34 : index
    %24 = vector.load %arg1[%c0_26, %c0_27, %c34] : memref<1x4x256xf32, #tpu.memory_space<vmem>>, vector<1x4x222xf32>
    %25 = vector.shape_cast %24 : vector<1x4x222xf32> to vector<4x222xf32>
    %c32_28 = arith.constant 32 : index
    %c0_29 = arith.constant 0 : index
    %26 = vector.load %arg6[%c32_28, %c0_29] : memref<36x222xf32, #tpu.memory_space<vmem>>, vector<4x222xf32>
    tpu.vector_store %arg6[%c32_28, %c0_29], %25 {strides = array<i32>} : memref<36x222xf32, #tpu.memory_space<vmem>>, vector<4x222xf32>,
    %c0_30 = arith.constant 0 : index
    %c0_31 = arith.constant 0 : index
    %27 = vector.load %arg2[%c0_30, %c0_31] : memref<8x36xf32, #tpu.memory_space<vmem>>, vector<8x36xf32>
    %c0_32 = arith.constant 0 : index
    %c0_33 = arith.constant 0 : index
    %28 = vector.load %arg6[%c0_32, %c0_33] : memref<36x222xf32, #tpu.memory_space<vmem>>, vector<36x222xf32>
    %cst = arith.constant dense<0.000000e+00> : vector<8x222xf32>
    %29 = tpu.matmul %27, %28, %cst {dimension_numbers = #tpu.dot_dimension_numbers<[1], [0], [0], [1], [0, 0, 1, 1], [], []>} : vector<8x36xf32>, vector<36x222xf32>, vector<8x222xf32> -> vector<8x222xf32>
    %c0_34 = arith.constant 0 : index
    %c0_35 = arith.constant 0 : index
    %30 = vector.load %arg3[%c0_34, %c0_35] : memref<8x1xf32, #tpu.memory_space<vmem>>, vector<8x1xf32>
    %31 = vector.broadcast %30 : vector<8x1xf32> to vector<8x222xf32>
    %32 = arith.addf %29, %31 : vector<8x222xf32>
    %cst_36 = arith.constant 0.000000e+00 : f32
    %33 = vector.broadcast %cst_36 : f32 to vector<8x222xf32>
    %34 = arith.cmpf ogt, %32, %33 : vector<8x222xf32>
    %cst_37 = arith.constant 0.00999999977 : f32
    %35 = vector.broadcast %cst_37 : f32 to vector<8x222xf32>
    %36 = arith.mulf %35, %32 : vector<8x222xf32>
    %37 = arith.select %34, %32, %36 : vector<8x222xi1>, vector<8x222xf32>
    %cst_38 = arith.constant 0.000000e+00 : f32
    %38 = vector.broadcast %cst_38 : f32 to vector<8x1xf32>
    %cst_39 = arith.constant 0.000000e+00 : f32
    %39 = vector.broadcast %cst_39 : f32 to vector<8x1xf32>
    %40 = vector.extract_strided_slice %37 {offsets = [0, 0], sizes = [8, 14], strides = [1, 1]} : vector<8x222xf32> to vector<8x14xf32>
    %c0_40 = arith.constant 0 : index
    %c0_41 = arith.constant 0 : index
    %c0_42 = arith.constant 0 : index
    %41 = vector.load %arg4[%c0_40, %c0_41, %c0_42] : memref<1x8x196xf32, #tpu.memory_space<vmem>>, vector<1x8x14xf32>
    %42 = vector.shape_cast %41 : vector<1x8x14xf32> to vector<8x14xf32>
    %43 = vector.shape_cast %40 : vector<8x14xf32> to vector<1x8x14xf32>
    tpu.vector_store %arg4[%c0_40, %c0_41, %c0_42], %43 {strides = array<i32>} : memref<1x8x196xf32, #tpu.memory_space<vmem>>, vector<1x8x14xf32>,
    %cst_43 = arith.constant dense<0.000000e+00> : vector<8xf32>
    %44 = vector.multi_reduction <add>, %40, %cst_43 [1] : vector<8x14xf32> to vector<8xf32>
    %45 = vector.shape_cast %44 : vector<8xf32> to vector<8x1xf32>
    %46 = arith.addf %38, %45 : vector<8x1xf32>
    %47 = arith.mulf %40, %40 : vector<8x14xf32>
    %cst_44 = arith.constant dense<0.000000e+00> : vector<8xf32>
    %48 = vector.multi_reduction <add>, %47, %cst_44 [1] : vector<8x14xf32> to vector<8xf32>
    %49 = vector.shape_cast %48 : vector<8xf32> to vector<8x1xf32>
    %50 = arith.addf %39, %49 : vector<8x1xf32>
    %51 = vector.extract_strided_slice %37 {offsets = [0, 16], sizes = [8, 14], strides = [1, 1]} : vector<8x222xf32> to vector<8x14xf32>
    %c0_45 = arith.constant 0 : index
    %c0_46 = arith.constant 0 : index
    %c14 = arith.constant 14 : index
    %52 = vector.load %arg4[%c0_45, %c0_46, %c14] : memref<1x8x196xf32, #tpu.memory_space<vmem>>, vector<1x8x14xf32>
    %53 = vector.shape_cast %52 : vector<1x8x14xf32> to vector<8x14xf32>
    %54 = vector.shape_cast %51 : vector<8x14xf32> to vector<1x8x14xf32>
    tpu.vector_store %arg4[%c0_45, %c0_46, %c14], %54 {strides = array<i32>} : memref<1x8x196xf32, #tpu.memory_space<vmem>>, vector<1x8x14xf32>,
    %cst_47 = arith.constant dense<0.000000e+00> : vector<8xf32>
    %55 = vector.multi_reduction <add>, %51, %cst_47 [1] : vector<8x14xf32> to vector<8xf32>
    %56 = vector.shape_cast %55 : vector<8xf32> to vector<8x1xf32>
    %57 = arith.addf %46, %56 : vector<8x1xf32>
    %58 = arith.mulf %51, %51 : vector<8x14xf32>
    %cst_48 = arith.constant dense<0.000000e+00> : vector<8xf32>
    %59 = vector.multi_reduction <add>, %58, %cst_48 [1] : vector<8x14xf32> to vector<8xf32>
    %60 = vector.shape_cast %59 : vector<8xf32> to vector<8x1xf32>
    %61 = arith.addf %50, %60 : vector<8x1xf32>
    %62 = vector.extract_strided_slice %37 {offsets = [0, 32], sizes = [8, 14], strides = [1, 1]} : vector<8x222xf32> to vector<8x14xf32>
    %c0_49 = arith.constant 0 : index
    %c0_50 = arith.constant 0 : index
    %c28_51 = arith.constant 28 : index
    %63 = vector.load %arg4[%c0_49, %c0_50, %c28_51] : memref<1x8x196xf32, #tpu.memory_space<vmem>>, vector<1x8x14xf32>
    %64 = vector.shape_cast %63 : vector<1x8x14xf32> to vector<8x14xf32>
    %65 = vector.shape_cast %62 : vector<8x14xf32> to vector<1x8x14xf32>
    tpu.vector_store %arg4[%c0_49, %c0_50, %c28_51], %65 {strides = array<i32>} : memref<1x8x196xf32, #tpu.memory_space<vmem>>, vector<1x8x14xf32>,
    %cst_52 = arith.constant dense<0.000000e+00> : vector<8xf32>
    %66 = vector.multi_reduction <add>, %62, %cst_52 [1] : vector<8x14xf32> to vector<8xf32>
    %67 = vector.shape_cast %66 : vector<8xf32> to vector<8x1xf32>
    %68 = arith.addf %57, %67 : vector<8x1xf32>
    %69 = arith.mulf %62, %62 : vector<8x14xf32>
    %cst_53 = arith.constant dense<0.000000e+00> : vector<8xf32>
    %70 = vector.multi_reduction <add>, %69, %cst_53 [1] : vector<8x14xf32> to vector<8xf32>
    %71 = vector.shape_cast %70 : vector<8xf32> to vector<8x1xf32>
    %72 = arith.addf %61, %71 : vector<8x1xf32>
    %73 = vector.extract_strided_slice %37 {offsets = [0, 48], sizes = [8, 14], strides = [1, 1]} : vector<8x222xf32> to vector<8x14xf32>
    %c0_54 = arith.constant 0 : index
    %c0_55 = arith.constant 0 : index
    %c42 = arith.constant 42 : index
    %74 = vector.load %arg4[%c0_54, %c0_55, %c42] : memref<1x8x196xf32, #tpu.memory_space<vmem>>, vector<1x8x14xf32>
    %75 = vector.shape_cast %74 : vector<1x8x14xf32> to vector<8x14xf32>
    %76 = vector.shape_cast %73 : vector<8x14xf32> to vector<1x8x14xf32>
    tpu.vector_store %arg4[%c0_54, %c0_55, %c42], %76 {strides = array<i32>} : memref<1x8x196xf32, #tpu.memory_space<vmem>>, vector<1x8x14xf32>,
    %cst_56 = arith.constant dense<0.000000e+00> : vector<8xf32>
    %77 = vector.multi_reduction <add>, %73, %cst_56 [1] : vector<8x14xf32> to vector<8xf32>
    %78 = vector.shape_cast %77 : vector<8xf32> to vector<8x1xf32>
    %79 = arith.addf %68, %78 : vector<8x1xf32>
    %80 = arith.mulf %73, %73 : vector<8x14xf32>
    %cst_57 = arith.constant dense<0.000000e+00> : vector<8xf32>
    %81 = vector.multi_reduction <add>, %80, %cst_57 [1] : vector<8x14xf32> to vector<8xf32>
    %82 = vector.shape_cast %81 : vector<8xf32> to vector<8x1xf32>
    %83 = arith.addf %72, %82 : vector<8x1xf32>
    %84 = vector.extract_strided_slice %37 {offsets = [0, 64], sizes = [8, 14], strides = [1, 1]} : vector<8x222xf32> to vector<8x14xf32>
    %c0_58 = arith.constant 0 : index
    %c0_59 = arith.constant 0 : index
    %c56 = arith.constant 56 : index
    %85 = vector.load %arg4[%c0_58, %c0_59, %c56] : memref<1x8x196xf32, #tpu.memory_space<vmem>>, vector<1x8x14xf32>
    %86 = vector.shape_cast %85 : vector<1x8x14xf32> to vector<8x14xf32>
    %87 = vector.shape_cast %84 : vector<8x14xf32> to vector<1x8x14xf32>
    tpu.vector_store %arg4[%c0_58, %c0_59, %c56], %87 {strides = array<i32>} : memref<1x8x196xf32, #tpu.memory_space<vmem>>, vector<1x8x14xf32>,
    %cst_60 = arith.constant dense<0.000000e+00> : vector<8xf32>
    %88 = vector.multi_reduction <add>, %84, %cst_60 [1] : vector<8x14xf32> to vector<8xf32>
    %89 = vector.shape_cast %88 : vector<8xf32> to vector<8x1xf32>
    %90 = arith.addf %79, %89 : vector<8x1xf32>
    %91 = arith.mulf %84, %84 : vector<8x14xf32>
    %cst_61 = arith.constant dense<0.000000e+00> : vector<8xf32>
    %92 = vector.multi_reduction <add>, %91, %cst_61 [1] : vector<8x14xf32> to vector<8xf32>
    %93 = vector.shape_cast %92 : vector<8xf32> to vector<8x1xf32>
    %94 = arith.addf %83, %93 : vector<8x1xf32>
    %95 = vector.extract_strided_slice %37 {offsets = [0, 80], sizes = [8, 14], strides = [1, 1]} : vector<8x222xf32> to vector<8x14xf32>
    %c0_62 = arith.constant 0 : index
    %c0_63 = arith.constant 0 : index
    %c70 = arith.constant 70 : index
    %96 = vector.load %arg4[%c0_62, %c0_63, %c70] : memref<1x8x196xf32, #tpu.memory_space<vmem>>, vector<1x8x14xf32>
    %97 = vector.shape_cast %96 : vector<1x8x14xf32> to vector<8x14xf32>
    %98 = vector.shape_cast %95 : vector<8x14xf32> to vector<1x8x14xf32>
    tpu.vector_store %arg4[%c0_62, %c0_63, %c70], %98 {strides = array<i32>} : memref<1x8x196xf32, #tpu.memory_space<vmem>>, vector<1x8x14xf32>,
    %cst_64 = arith.constant dense<0.000000e+00> : vector<8xf32>
    %99 = vector.multi_reduction <add>, %95, %cst_64 [1] : vector<8x14xf32> to vector<8xf32>
    %100 = vector.shape_cast %99 : vector<8xf32> to vector<8x1xf32>
    %101 = arith.addf %90, %100 : vector<8x1xf32>
    %102 = arith.mulf %95, %95 : vector<8x14xf32>
    %cst_65 = arith.constant dense<0.000000e+00> : vector<8xf32>
    %103 = vector.multi_reduction <add>, %102, %cst_65 [1] : vector<8x14xf32> to vector<8xf32>
    %104 = vector.shape_cast %103 : vector<8xf32> to vector<8x1xf32>
    %105 = arith.addf %94, %104 : vector<8x1xf32>
    %106 = vector.extract_strided_slice %37 {offsets = [0, 96], sizes = [8, 14], strides = [1, 1]} : vector<8x222xf32> to vector<8x14xf32>
    %c0_66 = arith.constant 0 : index
    %c0_67 = arith.constant 0 : index
    %c84 = arith.constant 84 : index
    %107 = vector.load %arg4[%c0_66, %c0_67, %c84] : memref<1x8x196xf32, #tpu.memory_space<vmem>>, vector<1x8x14xf32>
    %108 = vector.shape_cast %107 : vector<1x8x14xf32> to vector<8x14xf32>
    %109 = vector.shape_cast %106 : vector<8x14xf32> to vector<1x8x14xf32>
    tpu.vector_store %arg4[%c0_66, %c0_67, %c84], %109 {strides = array<i32>} : memref<1x8x196xf32, #tpu.memory_space<vmem>>, vector<1x8x14xf32>,
    %cst_68 = arith.constant dense<0.000000e+00> : vector<8xf32>
    %110 = vector.multi_reduction <add>, %106, %cst_68 [1] : vector<8x14xf32> to vector<8xf32>
    %111 = vector.shape_cast %110 : vector<8xf32> to vector<8x1xf32>
    %112 = arith.addf %101, %111 : vector<8x1xf32>
    %113 = arith.mulf %106, %106 : vector<8x14xf32>
    %cst_69 = arith.constant dense<0.000000e+00> : vector<8xf32>
    %114 = vector.multi_reduction <add>, %113, %cst_69 [1] : vector<8x14xf32> to vector<8xf32>
    %115 = vector.shape_cast %114 : vector<8xf32> to vector<8x1xf32>
    %116 = arith.addf %105, %115 : vector<8x1xf32>
    %117 = vector.extract_strided_slice %37 {offsets = [0, 112], sizes = [8, 14], strides = [1, 1]} : vector<8x222xf32> to vector<8x14xf32>
    %c0_70 = arith.constant 0 : index
    %c0_71 = arith.constant 0 : index
    %c98 = arith.constant 98 : index
    %118 = vector.load %arg4[%c0_70, %c0_71, %c98] : memref<1x8x196xf32, #tpu.memory_space<vmem>>, vector<1x8x14xf32>
    %119 = vector.shape_cast %118 : vector<1x8x14xf32> to vector<8x14xf32>
    %120 = vector.shape_cast %117 : vector<8x14xf32> to vector<1x8x14xf32>
    tpu.vector_store %arg4[%c0_70, %c0_71, %c98], %120 {strides = array<i32>} : memref<1x8x196xf32, #tpu.memory_space<vmem>>, vector<1x8x14xf32>,
    %cst_72 = arith.constant dense<0.000000e+00> : vector<8xf32>
    %121 = vector.multi_reduction <add>, %117, %cst_72 [1] : vector<8x14xf32> to vector<8xf32>
    %122 = vector.shape_cast %121 : vector<8xf32> to vector<8x1xf32>
    %123 = arith.addf %112, %122 : vector<8x1xf32>
    %124 = arith.mulf %117, %117 : vector<8x14xf32>
    %cst_73 = arith.constant dense<0.000000e+00> : vector<8xf32>
    %125 = vector.multi_reduction <add>, %124, %cst_73 [1] : vector<8x14xf32> to vector<8xf32>
    %126 = vector.shape_cast %125 : vector<8xf32> to vector<8x1xf32>
    %127 = arith.addf %116, %126 : vector<8x1xf32>
    %128 = vector.extract_strided_slice %37 {offsets = [0, 128], sizes = [8, 14], strides = [1, 1]} : vector<8x222xf32> to vector<8x14xf32>
    %c0_74 = arith.constant 0 : index
    %c0_75 = arith.constant 0 : index
    %c112 = arith.constant 112 : index
    %129 = vector.load %arg4[%c0_74, %c0_75, %c112] : memref<1x8x196xf32, #tpu.memory_space<vmem>>, vector<1x8x14xf32>
    %130 = vector.shape_cast %129 : vector<1x8x14xf32> to vector<8x14xf32>
    %131 = vector.shape_cast %128 : vector<8x14xf32> to vector<1x8x14xf32>
    tpu.vector_store %arg4[%c0_74, %c0_75, %c112], %131 {strides = array<i32>} : memref<1x8x196xf32, #tpu.memory_space<vmem>>, vector<1x8x14xf32>,
    %cst_76 = arith.constant dense<0.000000e+00> : vector<8xf32>
    %132 = vector.multi_reduction <add>, %128, %cst_76 [1] : vector<8x14xf32> to vector<8xf32>
    %133 = vector.shape_cast %132 : vector<8xf32> to vector<8x1xf32>
    %134 = arith.addf %123, %133 : vector<8x1xf32>
    %135 = arith.mulf %128, %128 : vector<8x14xf32>
    %cst_77 = arith.constant dense<0.000000e+00> : vector<8xf32>
    %136 = vector.multi_reduction <add>, %135, %cst_77 [1] : vector<8x14xf32> to vector<8xf32>
    %137 = vector.shape_cast %136 : vector<8xf32> to vector<8x1xf32>
    %138 = arith.addf %127, %137 : vector<8x1xf32>
    %139 = vector.extract_strided_slice %37 {offsets = [0, 144], sizes = [8, 14], strides = [1, 1]} : vector<8x222xf32> to vector<8x14xf32>
    %c0_78 = arith.constant 0 : index
    %c0_79 = arith.constant 0 : index
    %c126 = arith.constant 126 : index
    %140 = vector.load %arg4[%c0_78, %c0_79, %c126] : memref<1x8x196xf32, #tpu.memory_space<vmem>>, vector<1x8x14xf32>
    %141 = vector.shape_cast %140 : vector<1x8x14xf32> to vector<8x14xf32>
    %142 = vector.shape_cast %139 : vector<8x14xf32> to vector<1x8x14xf32>
    tpu.vector_store %arg4[%c0_78, %c0_79, %c126], %142 {strides = array<i32>} : memref<1x8x196xf32, #tpu.memory_space<vmem>>, vector<1x8x14xf32>,
    %cst_80 = arith.constant dense<0.000000e+00> : vector<8xf32>
    %143 = vector.multi_reduction <add>, %139, %cst_80 [1] : vector<8x14xf32> to vector<8xf32>
    %144 = vector.shape_cast %143 : vector<8xf32> to vector<8x1xf32>
    %145 = arith.addf %134, %144 : vector<8x1xf32>
    %146 = arith.mulf %139, %139 : vector<8x14xf32>
    %cst_81 = arith.constant dense<0.000000e+00> : vector<8xf32>
    %147 = vector.multi_reduction <add>, %146, %cst_81 [1] : vector<8x14xf32> to vector<8xf32>
    %148 = vector.shape_cast %147 : vector<8xf32> to vector<8x1xf32>
    %149 = arith.addf %138, %148 : vector<8x1xf32>
    %150 = vector.extract_strided_slice %37 {offsets = [0, 160], sizes = [8, 14], strides = [1, 1]} : vector<8x222xf32> to vector<8x14xf32>
    %c0_82 = arith.constant 0 : index
    %c0_83 = arith.constant 0 : index
    %c140 = arith.constant 140 : index
    %151 = vector.load %arg4[%c0_82, %c0_83, %c140] : memref<1x8x196xf32, #tpu.memory_space<vmem>>, vector<1x8x14xf32>
    %152 = vector.shape_cast %151 : vector<1x8x14xf32> to vector<8x14xf32>
    %153 = vector.shape_cast %150 : vector<8x14xf32> to vector<1x8x14xf32>
    tpu.vector_store %arg4[%c0_82, %c0_83, %c140], %153 {strides = array<i32>} : memref<1x8x196xf32, #tpu.memory_space<vmem>>, vector<1x8x14xf32>,
    %cst_84 = arith.constant dense<0.000000e+00> : vector<8xf32>
    %154 = vector.multi_reduction <add>, %150, %cst_84 [1] : vector<8x14xf32> to vector<8xf32>
    %155 = vector.shape_cast %154 : vector<8xf32> to vector<8x1xf32>
    %156 = arith.addf %145, %155 : vector<8x1xf32>
    %157 = arith.mulf %150, %150 : vector<8x14xf32>
    %cst_85 = arith.constant dense<0.000000e+00> : vector<8xf32>
    %158 = vector.multi_reduction <add>, %157, %cst_85 [1] : vector<8x14xf32> to vector<8xf32>
    %159 = vector.shape_cast %158 : vector<8xf32> to vector<8x1xf32>
    %160 = arith.addf %149, %159 : vector<8x1xf32>
    %161 = vector.extract_strided_slice %37 {offsets = [0, 176], sizes = [8, 14], strides = [1, 1]} : vector<8x222xf32> to vector<8x14xf32>
    %c0_86 = arith.constant 0 : index
    %c0_87 = arith.constant 0 : index
    %c154 = arith.constant 154 : index
    %162 = vector.load %arg4[%c0_86, %c0_87, %c154] : memref<1x8x196xf32, #tpu.memory_space<vmem>>, vector<1x8x14xf32>
    %163 = vector.shape_cast %162 : vector<1x8x14xf32> to vector<8x14xf32>
    %164 = vector.shape_cast %161 : vector<8x14xf32> to vector<1x8x14xf32>
    tpu.vector_store %arg4[%c0_86, %c0_87, %c154], %164 {strides = array<i32>} : memref<1x8x196xf32, #tpu.memory_space<vmem>>, vector<1x8x14xf32>,
    %cst_88 = arith.constant dense<0.000000e+00> : vector<8xf32>
    %165 = vector.multi_reduction <add>, %161, %cst_88 [1] : vector<8x14xf32> to vector<8xf32>
    %166 = vector.shape_cast %165 : vector<8xf32> to vector<8x1xf32>
    %167 = arith.addf %156, %166 : vector<8x1xf32>
    %168 = arith.mulf %161, %161 : vector<8x14xf32>
    %cst_89 = arith.constant dense<0.000000e+00> : vector<8xf32>
    %169 = vector.multi_reduction <add>, %168, %cst_89 [1] : vector<8x14xf32> to vector<8xf32>
    %170 = vector.shape_cast %169 : vector<8xf32> to vector<8x1xf32>
    %171 = arith.addf %160, %170 : vector<8x1xf32>
    %172 = vector.extract_strided_slice %37 {offsets = [0, 192], sizes = [8, 14], strides = [1, 1]} : vector<8x222xf32> to vector<8x14xf32>
    %c0_90 = arith.constant 0 : index
    %c0_91 = arith.constant 0 : index
    %c168 = arith.constant 168 : index
    %173 = vector.load %arg4[%c0_90, %c0_91, %c168] : memref<1x8x196xf32, #tpu.memory_space<vmem>>, vector<1x8x14xf32>
    %174 = vector.shape_cast %173 : vector<1x8x14xf32> to vector<8x14xf32>
    %175 = vector.shape_cast %172 : vector<8x14xf32> to vector<1x8x14xf32>
    tpu.vector_store %arg4[%c0_90, %c0_91, %c168], %175 {strides = array<i32>} : memref<1x8x196xf32, #tpu.memory_space<vmem>>, vector<1x8x14xf32>,
    %cst_92 = arith.constant dense<0.000000e+00> : vector<8xf32>
    %176 = vector.multi_reduction <add>, %172, %cst_92 [1] : vector<8x14xf32> to vector<8xf32>
    %177 = vector.shape_cast %176 : vector<8xf32> to vector<8x1xf32>
    %178 = arith.addf %167, %177 : vector<8x1xf32>
    %179 = arith.mulf %172, %172 : vector<8x14xf32>
    %cst_93 = arith.constant dense<0.000000e+00> : vector<8xf32>
    %180 = vector.multi_reduction <add>, %179, %cst_93 [1] : vector<8x14xf32> to vector<8xf32>
    %181 = vector.shape_cast %180 : vector<8xf32> to vector<8x1xf32>
    %182 = arith.addf %171, %181 : vector<8x1xf32>
    %183 = vector.extract_strided_slice %37 {offsets = [0, 208], sizes = [8, 14], strides = [1, 1]} : vector<8x222xf32> to vector<8x14xf32>
    %c0_94 = arith.constant 0 : index
    %c0_95 = arith.constant 0 : index
    %c182 = arith.constant 182 : index
    %184 = vector.load %arg4[%c0_94, %c0_95, %c182] : memref<1x8x196xf32, #tpu.memory_space<vmem>>, vector<1x8x14xf32>
    %185 = vector.shape_cast %184 : vector<1x8x14xf32> to vector<8x14xf32>
    %186 = vector.shape_cast %183 : vector<8x14xf32> to vector<1x8x14xf32>
    tpu.vector_store %arg4[%c0_94, %c0_95, %c182], %186 {strides = array<i32>} : memref<1x8x196xf32, #tpu.memory_space<vmem>>, vector<1x8x14xf32>,
    %cst_96 = arith.constant dense<0.000000e+00> : vector<8xf32>
    %187 = vector.multi_reduction <add>, %183, %cst_96 [1] : vector<8x14xf32> to vector<8xf32>
    %188 = vector.shape_cast %187 : vector<8xf32> to vector<8x1xf32>
    %189 = arith.addf %178, %188 : vector<8x1xf32>
    %190 = arith.mulf %183, %183 : vector<8x14xf32>
    %cst_97 = arith.constant dense<0.000000e+00> : vector<8xf32>
    %191 = vector.multi_reduction <add>, %190, %cst_97 [1] : vector<8x14xf32> to vector<8xf32>
    %192 = vector.shape_cast %191 : vector<8xf32> to vector<8x1xf32>
    %193 = arith.addf %182, %192 : vector<8x1xf32>
    %c0_98 = arith.constant 0 : index
    %c0_99 = arith.constant 0 : index
    %c0_100 = arith.constant 0 : index
    %194 = vector.load %arg5[%c0_98, %c0_99, %c0_100] : memref<1x8x2xf32, #tpu.memory_space<vmem>>, vector<1x8x1xf32>
    %195 = vector.shape_cast %194 : vector<1x8x1xf32> to vector<8x1xf32>
    %196 = vector.shape_cast %189 : vector<8x1xf32> to vector<1x8x1xf32>
    tpu.vector_store %arg5[%c0_98, %c0_99, %c0_100], %196 {strides = array<i32>} : memref<1x8x2xf32, #tpu.memory_space<vmem>>, vector<1x8x1xf32>,
    %c0_101 = arith.constant 0 : index
    %c0_102 = arith.constant 0 : index
    %c1_103 = arith.constant 1 : index
    %197 = vector.load %arg5[%c0_101, %c0_102, %c1_103] : memref<1x8x2xf32, #tpu.memory_space<vmem>>, vector<1x8x1xf32>
    %198 = vector.shape_cast %197 : vector<1x8x1xf32> to vector<8x1xf32>
    %199 = vector.shape_cast %193 : vector<8x1xf32> to vector<1x8x1xf32>
    tpu.vector_store %arg5[%c0_101, %c0_102, %c1_103], %199 {strides = array<i32>} : memref<1x8x2xf32, #tpu.memory_space<vmem>>, vector<1x8x1xf32>,
    return
  }
  func.func @transform_0(%arg0: i32) -> (i32, i32, i32) {
    %c0_i32 = arith.constant 0 : i32
    %c0_i32_0 = arith.constant 0 : i32
    %c0_i32_1 = arith.constant 0 : i32
    return %arg0, %c0_i32, %c0_i32_0 : i32, i32, i32
  }
  func.func @transform_1(%arg0: i32) -> (i32, i32) {
    %c0_i32 = arith.constant 0 : i32
    %c0_i32_0 = arith.constant 0 : i32
    %c0_i32_1 = arith.constant 0 : i32
    return %c0_i32, %c0_i32_0 : i32, i32
  }
  func.func @transform_2(%arg0: i32) -> (i32, i32) {
    %c0_i32 = arith.constant 0 : i32
    %c0_i32_0 = arith.constant 0 : i32
    %c0_i32_1 = arith.constant 0 : i32
    return %c0_i32, %c0_i32_0 : i32, i32
  }
  func.func @transform_3(%arg0: i32) -> (i32, i32, i32) {
    %c0_i32 = arith.constant 0 : i32
    %c0_i32_0 = arith.constant 0 : i32
    %c0_i32_1 = arith.constant 0 : i32
    return %arg0, %c0_i32, %c0_i32_0 : i32, i32, i32
  }
  func.func @transform_4(%arg0: i32) -> (i32, i32, i32) {
    %c0_i32 = arith.constant 0 : i32
    %c0_i32_0 = arith.constant 0 : i32
    %c0_i32_1 = arith.constant 0 : i32
    return %arg0, %c0_i32, %c0_i32_0 : i32, i32, i32
  }
}

module attributes {stable_mosaic.version = 11 : i64} {
  func.func @_bn_apply_kernel(%arg0: i32, %arg1: memref<1x8x196xf32, #tpu.memory_space<vmem>>, %arg2: memref<2x8x2xf32, #tpu.memory_space<vmem>>, %arg3: memref<8x1xf32, #tpu.memory_space<vmem>>, %arg4: memref<8x1xf32, #tpu.memory_space<vmem>>, %arg5: memref<1x8x196xf32, #tpu.memory_space<vmem>>) attributes {dimension_semantics = [#tpu.dimension_semantics<parallel>], iteration_bounds = array<i64: 2>, scalar_prefetch = 0 : i64, scratch_operands = 0 : i64, tpu.core_type = #tpu.core_type<tc>, window_params = [{transform_indices = @transform_0, window_bounds = array<i64: 1, 8, 196>}, {pipeline_mode = #tpu.pipeline_mode<synchronous>, transform_indices = @transform_1, window_bounds = array<i64: 2, 8, 2>}, {pipeline_mode = #tpu.pipeline_mode<synchronous>, transform_indices = @transform_2, window_bounds = array<i64: 8, 1>}, {pipeline_mode = #tpu.pipeline_mode<synchronous>, transform_indices = @transform_3, window_bounds = array<i64: 8, 1>}, {transform_indices = @transform_4, window_bounds = array<i64: 1, 8, 196>}]} {
    %c0 = arith.constant 0 : index
    %c0_0 = arith.constant 0 : index
    %c0_1 = arith.constant 0 : index
    %0 = vector.load %arg2[%c0, %c0_0, %c0_1] : memref<2x8x2xf32, #tpu.memory_space<vmem>>, vector<2x8x2xf32>
    %cst = arith.constant dense<0.000000e+00> : vector<8x2xf32>
    %1 = vector.multi_reduction <add>, %0, %cst [0] : vector<2x8x2xf32> to vector<8x2xf32>
    %2 = vector.extract_strided_slice %1 {offsets = [0, 0], sizes = [8, 1], strides = [1, 1]} : vector<8x2xf32> to vector<8x1xf32>
    %cst_2 = arith.constant 0.00255102036 : f32
    %3 = vector.broadcast %cst_2 : f32 to vector<8x1xf32>
    %4 = arith.mulf %2, %3 : vector<8x1xf32>
    %5 = vector.extract_strided_slice %1 {offsets = [0, 1], sizes = [8, 1], strides = [1, 1]} : vector<8x2xf32> to vector<8x1xf32>
    %cst_3 = arith.constant 0.00255102036 : f32
    %6 = vector.broadcast %cst_3 : f32 to vector<8x1xf32>
    %7 = arith.mulf %5, %6 : vector<8x1xf32>
    %8 = arith.mulf %4, %4 : vector<8x1xf32>
    %9 = arith.subf %7, %8 : vector<8x1xf32>
    %c0_4 = arith.constant 0 : index
    %c0_5 = arith.constant 0 : index
    %10 = vector.load %arg3[%c0_4, %c0_5] : memref<8x1xf32, #tpu.memory_space<vmem>>, vector<8x1xf32>
    %cst_6 = arith.constant 9.99999974E-6 : f32
    %11 = vector.broadcast %cst_6 : f32 to vector<8x1xf32>
    %12 = arith.addf %9, %11 : vector<8x1xf32>
    %13 = math.rsqrt %12 : vector<8x1xf32>
    %14 = arith.mulf %10, %13 : vector<8x1xf32>
    %c0_7 = arith.constant 0 : index
    %c0_8 = arith.constant 0 : index
    %15 = vector.load %arg4[%c0_7, %c0_8] : memref<8x1xf32, #tpu.memory_space<vmem>>, vector<8x1xf32>
    %16 = arith.mulf %4, %14 : vector<8x1xf32>
    %17 = arith.subf %15, %16 : vector<8x1xf32>
    %c0_9 = arith.constant 0 : index
    %c0_10 = arith.constant 0 : index
    %c0_11 = arith.constant 0 : index
    %18 = vector.load %arg1[%c0_9, %c0_10, %c0_11] : memref<1x8x196xf32, #tpu.memory_space<vmem>>, vector<1x8x196xf32>
    %19 = vector.shape_cast %18 : vector<1x8x196xf32> to vector<8x196xf32>
    %20 = vector.broadcast %14 : vector<8x1xf32> to vector<8x196xf32>
    %21 = arith.mulf %19, %20 : vector<8x196xf32>
    %22 = vector.broadcast %17 : vector<8x1xf32> to vector<8x196xf32>
    %23 = arith.addf %21, %22 : vector<8x196xf32>
    %c0_12 = arith.constant 0 : index
    %c0_13 = arith.constant 0 : index
    %c0_14 = arith.constant 0 : index
    %24 = vector.load %arg5[%c0_12, %c0_13, %c0_14] : memref<1x8x196xf32, #tpu.memory_space<vmem>>, vector<1x8x196xf32>
    %25 = vector.shape_cast %24 : vector<1x8x196xf32> to vector<8x196xf32>
    %26 = vector.shape_cast %23 : vector<8x196xf32> to vector<1x8x196xf32>
    tpu.vector_store %arg5[%c0_12, %c0_13, %c0_14], %26 {strides = array<i32>} : memref<1x8x196xf32, #tpu.memory_space<vmem>>, vector<1x8x196xf32>,
    return
  }
  func.func @transform_0(%arg0: i32) -> (i32, i32, i32) {
    %c0_i32 = arith.constant 0 : i32
    %c0_i32_0 = arith.constant 0 : i32
    %c0_i32_1 = arith.constant 0 : i32
    return %arg0, %c0_i32, %c0_i32_0 : i32, i32, i32
  }
  func.func @transform_1(%arg0: i32) -> (i32, i32, i32) {
    %c0_i32 = arith.constant 0 : i32
    %c0_i32_0 = arith.constant 0 : i32
    %c0_i32_1 = arith.constant 0 : i32
    %c0_i32_2 = arith.constant 0 : i32
    return %c0_i32, %c0_i32_0, %c0_i32_1 : i32, i32, i32
  }
  func.func @transform_2(%arg0: i32) -> (i32, i32) {
    %c0_i32 = arith.constant 0 : i32
    %c0_i32_0 = arith.constant 0 : i32
    %c0_i32_1 = arith.constant 0 : i32
    return %c0_i32, %c0_i32_0 : i32, i32
  }
  func.func @transform_3(%arg0: i32) -> (i32, i32) {
    %c0_i32 = arith.constant 0 : i32
    %c0_i32_0 = arith.constant 0 : i32
    %c0_i32_1 = arith.constant 0 : i32
    return %c0_i32, %c0_i32_0 : i32, i32
  }
  func.func @transform_4(%arg0: i32) -> (i32, i32, i32) {
    %c0_i32 = arith.constant 0 : i32
    %c0_i32_0 = arith.constant 0 : i32
    %c0_i32_1 = arith.constant 0 : i32
    return %arg0, %c0_i32, %c0_i32_0 : i32, i32, i32
  }
}

</mosaic_0001>

<bundles_post_ra>
// kernel: conv_block_forward.3
= control target key start
LH: loop header
LB: loop body
LE: loop exit
PB: predicated region body
PF: predicated region fallthrough
CT: control target
= control target key end

     0   :  { %s360_s15 = smov 0   ;;  %s393_s0 = inlined_call_operand.vmem [shape: f32[2,8,196], index: 0, kind: input, shape index: {}]   ;;  %s394_s1 = inlined_call_operand.vmem [shape: f32[2,8,2], index: 1, kind: input, shape index: {}]   ;;  %s395_s2 = inlined_call_operand.vmem [shape: f32[8,1], index: 2, kind: input, shape index: {}]   ;;  %s396_s3 = inlined_call_operand.vmem [shape: f32[8,1], index: 3, kind: input, shape index: {}]   ;;  %s397_s4 = inlined_call_operand.vmem [shape: f32[2,8,196], index: 4, kind: output, shape index: {}]  }
   0x1 LB: > { %s296_s16 = sadd.s32 4294967295, %s330_s15   ;;  %p300_p0 = scmp.ge.s32.totalorder %s330_s15, 1  ;;  %s330_s15 = sphi %s360_s15, %s14_s15  }
   0x2   : > { %p162_p1 = scmp.lt.s32.totalorder %s330_s15, 3 }
   0x4   : > { %p163_p2 = pnand %p300_p0, %p162_p1 }
   0x5   : > { %v198_v0 = vld [vmem:[%s394_s1] sm:$0xff] (!%p163_p2)  ;;  %v199_v1 = vld [vmem:[%s394_s1 + $0x8] sm:$0xff] (!%p163_p2)  ;;  %vm200_vm0 = vcmask (!%p163_p2), 15360   ;;  %s332_s21 = smov (!%p163_p2), 1   ;;  %v333_v10 = vmov (!%p163_p2), 0   ;;  %s334_s22 = smov (!%p163_p2), 127  }
   0x6   : > { %166 = sbr.rel (%p163_p2) target bundleno = 395 (0x18b), region = 36  ;;  %v201_v2 = vsel (!%p163_p2), %vm200_vm0, %v198_v0, 0.0  ;;  %v202_v3 = vsel (!%p163_p2), %vm200_vm0, %v199_v1, 0.0  ;;  %320 = vset.pattern.permute.xlu1 (!%p163_p2), %v333_v10  ;;  %321 = vset.pattern.permute.xlu0 (!%p163_p2), %v333_v10  ;;  %v211_v12 = vld [vmem:[%s395_s2] sm:$0xff] (!%p163_p2)  ;;  %p188_p3 = scmp.lt.s32.totalorder (!%p163_p2), %s296_s16, 1  ;;  %vm239_vm1 = vcmask (!%p163_p2), 556032  }
   0x7   : > { %v203_v4 = vadd.f32 (!%p163_p2), %v202_v3, %v201_v2  ;;  %v219_v15 = vld [vmem:[%s396_s3] sm:$0xff] (!%p163_p2) }
   0x9   : > { %v204_v5 = vmul.f32 (!%p163_p2), 0.0025510204, %v203_v4 }
   0xb   : > { %v205_v6 = vmul.f32 (!%p163_p2), %v204_v5, %v204_v5 }
   0xd   : > { %207 = vrot.lane.b32.xlu0 %v205_v6, %s332_s21  ;;  %s399_s16 = smov (!%p188_p3, %s296_s16), 1 }
   0xe   : > { %s307_s27 = sshll.u32 %s399_s16, 4 }
   0xf   : > { %s192_s30 = scalar_lea.vmem %s393_s0, %s307_s27  ;;  %s197_s7 = scalar_lea.vmem %s397_s4, %s307_s27 }
  0x10   : > { %v222_v19 = vld [vmem:[%s192_s30] sm:$0xff]  ;;  %v223_v20 = vld [vmem:[%s192_s30 + $0x8] sm:$0xff] }
  0x7f   : > { %v208_v7 = vpop.permute.xlu0 %207 }
  0x80   : > { %v210_v8 = vsub.f32 %v204_v5, %v208_v7 }
  0x82   : > { %v212_v9 = vadd.f32 1e-05, %v210_v8 }
  0x84   : > { %322 = vrsqrt.f32 %v212_v9 }
  0x8e   : > { %v323_v11 = vpop.eup %322 }
  0x8f   : > { %215 = vrot.lane.b32.xlu0 %v323_v11, %s334_s22 }
 0x101   : > { %v216_v13 = vpop.permute.xlu0 %215 }
 0x102   : > { %v218_v14 = vmul.f32 %v216_v13, %v211_v12 }
 0x104   : > { %v220_v16 = vmul.f32 %v218_v14, %v204_v5  ;;  %226 = vperm.xlu1 %320, %v218_v14  }
 0x106   : > { %v221_v17 = vsub.f32 %v219_v15, %v220_v16 }
 0x108   : > { %233 = vperm.xlu1 %320, %v221_v17  }
 0x183   : > { %v227_v18 = vpop.permute.xlu1 %226 }
 0x184   : > { %v229_v21 = vmul.f32 %v227_v18, %v222_v19  ;;  %v230_v22 = vmul.f32 %v227_v18, %v223_v20 }
 0x187   : > { %v234_v23 = vpop.permute.xlu1 %233 }
 0x188   : > { %v236_v24 = vadd.f32 %v234_v23, %v229_v21  ;;  %v237_v25 = vadd.f32 %v234_v23, %v230_v22 }
 0x18a   : > { %238 = vst [vmem:[%s197_s7] sm:$0xff] %v236_v24  ;;  %240 = vst.msk [vmem:[%s197_s7 + $0x8] sm:$0xff] %vm239_vm1, %v237_v25 }
 0x18b PF: > { %s14_s15 = sadd.s32 1, %s330_s15  }
 0x18c   : > { %p11_p4 = scmp.ge.s32.totalorder %s14_s15, 4  }
 0x18e   :  { %13 = sbr.rel (!%p11_p4) target bundleno = 1 (0x1), region = 66 }

// kernel: conv_block_forward.2
= control target key start
LH: loop header
LB: loop body
LE: loop exit
PB: predicated region body
PF: predicated region fallthrough
CT: control target
= control target key end

     0   :  { %s891_s15 = smov 0   ;;  %s1033_s0 = inlined_call_operand.vmem [shape: f32[2,4,256], index: 0, kind: input, shape index: {}]   ;;  %s1034_s1 = inlined_call_operand.vmem [shape: f32[8,36], index: 1, kind: input, shape index: {}]   ;;  %s1035_s2 = inlined_call_operand.vmem [shape: f32[8,1], index: 2, kind: input, shape index: {}]   ;;  %s1036_s3 = inlined_call_operand.vmem [shape: f32[2,8,196], index: 3, kind: output, shape index: {0}]   ;;  %s1037_s4 = inlined_call_operand.vmem [shape: f32[2,8,2], index: 4, kind: output, shape index: {1}]  }
   0x1 LB: > { %s772_s16 = sadd.s32 4294967295, %s839_s15   ;;  %p776_p0 = scmp.ge.s32.totalorder %s839_s15, 1  ;;  %s839_s15 = sphi %s891_s15, %s15_s15  }
   0x2   : > { %p165_p1 = scmp.lt.s32.totalorder %s839_s15, 3 }
   0x4   : > { %p166_p2 = pnand %p776_p0, %p165_p1 }
   0x5   : > { %p195_p3 = scmp.lt.s32.totalorder (!%p166_p2), %s772_s16, 1  ;;  %vm214_vm0 = vcmask (!%p166_p2), 764928   ;;  %s841_s21 = smov (!%p166_p2), 126   ;;  %v848_v3 = vmov (!%p166_p2), 0.0   ;;  %v850_v4 = vmov (!%p166_p2), 0   ;;  %v332_v5 = vld [vmem:[%s1035_s2] sm:$0xff] (!%p166_p2) }
   0x6   : > { %169 = sbr.rel (%p166_p2) target bundleno = 1081 (0x439), region = 32  ;;  %s842_s22 = smov (!%p166_p2), 127   ;;  %413 = vmatprep.mubr.f32.mxu0 (!%p166_p2), %v848_v3  ;;  %830 = vset.pattern.permute.xlu0 (!%p166_p2), %v850_v4  ;;  %vm228_vm1 = vcmask (!%p166_p2), 769028   ;;  %vm223_vm2 = vcmask (!%p166_p2), 1039360   ;;  %vm237_vm3 = vcmask (!%p166_p2), 1031168   ;;  %vm250_vm4 = vcmask (!%p166_p2), 916480  }
   0x7   : > { %s843_s23 = smov (!%p166_p2), 112   ;;  %s844_s24 = smov (!%p166_p2), 111   ;;  %vm263_vm5 = vcmask (!%p166_p2), 908288   ;;  %vm276_vm6 = vcmask (!%p166_p2), 900096   ;;  %vm289_vm7 = vcmask (!%p166_p2), 785408   ;;  %vm302_vm8 = vcmask (!%p166_p2), 777216  }
   0x8   : > { %s845_s25 = smov (!%p166_p2), 110   ;;  %s846_s26 = smov (!%p166_p2), 96   ;;  %vm315_vm9 = vcmask (!%p166_p2), 769024   ;;  %vm342_vm10 = vcmask (!%p166_p2), 1043456   ;;  %v321_v44 = vld [vmem:[%s1034_s1] sm:$0xff] (!%p166_p2)  ;;  %vm338_vm11 = vcmask (!%p166_p2), 293888  }
   0x9   : > { %s847_s27 = smov (!%p166_p2), 95   ;;  %s849_s28 = smov (!%p166_p2), 94   ;;  %vm426_vm13 = vcmask (!%p166_p2), 113664   ;;  %vm441_vm15 = vcmask (!%p166_p2), 228464  }
   0xa   : > { %s851_s11 = smov (!%p166_p2), 124   ;;  %s852_s12 = smov (!%p166_p2), 80  }
   0xb   : > { %s853_s13 = smov (!%p166_p2), 122   ;;  %s854_s14 = smov (!%p166_p2), 64  }
   0xc   : > { %s855_s18 = smov (!%p166_p2), 120   ;;  %s856_s19 = smov (!%p166_p2), 32  }
   0xd   : > { %s1039_s16 = smov (!%p195_p3, %s772_s16), 1 }
   0xe   : > { %s787_s17 = sshll.u32 %s1039_s16, 3  ;;  %s788_s7 = sshll.u32 %s1039_s16, 4 }
   0xf   : > { %s199_s20 = scalar_lea.vmem %s1033_s0, %s787_s17  ;;  %s934_s10 = scalar_lea.vmem %s1036_s3, %s788_s7 }
  0x10   : > { %v230_v0 = vld [vmem:[%s199_s20] sm:$0xff]  ;;  %s857_s20 = smov 118   ;;  %s208_s5 = scalar_lea.vmem %s1037_s4, %s787_s17 }
  0x11   : > { %233 = vrot.lane.b32.xlu1 %v230_v0, %s841_s21  ;;  %v232_v1 = vcombine.high %v230_v0, %v230_v0  ;;  %221 = vrot.lane.b32.xlu0 %v230_v0, %s842_s22  ;;  %v218_v2 = vcombine.low %v230_v0, %v230_v0  ;;  %213 = vst [vmem:[#allocation2] sm:$0xf] %v230_v0 }
  0x13   : > { %215 = vst.msk [vmem:[#allocation2 + $0x8] sm:$0xf] %vm214_vm0, %v232_v1 }
  0x15   : > { %248 = vrot.lane.b32.xlu1 %v230_v0, %s843_s23  ;;  %219 = vrot.lane.b32.xlu0 %v218_v2, %s842_s22  ;;  %s859_s22 = smov 108  }
  0x19   : > { %235 = vrot.lane.b32.xlu1 %v232_v1, %s841_s21  ;;  %246 = vrot.lane.b32.xlu0 %v218_v2, %s843_s23 }
  0x1d   : > { %261 = vrot.lane.b32.xlu1 %v232_v1, %s844_s24  ;;  %259 = vrot.lane.b32.xlu0 %v230_v0, %s844_s24  ;;  %s860_s24 = smov 116  }
  0x21   : > { %274 = vrot.lane.b32.xlu1 %v230_v0, %s845_s25  ;;  %272 = vrot.lane.b32.xlu0 %v218_v2, %s845_s25 }
  0x25   : > { %287 = vrot.lane.b32.xlu1 %v232_v1, %s846_s26  ;;  %285 = vrot.lane.b32.xlu0 %v230_v0, %s846_s26 }
  0x29   : > { %300 = vrot.lane.b32.xlu1 %v230_v0, %s847_s27  ;;  %298 = vrot.lane.b32.xlu0 %v218_v2, %s847_s27  ;;  %s861_s27 = smov 114  }
  0x2d   : > { %313 = vrot.lane.b32.xlu1 %v232_v1, %s849_s28  ;;  %311 = vrot.lane.b32.xlu0 %v230_v0, %s849_s28  ;;  %s862_s28 = smov 16  }
  0x31   : > { %335 = vperm.xlu0 %830, %v332_v5  }
  0x83   : > { %v234_v6 = vpop.permute.xlu1 %233  ;;  %v222_v7 = vpop.permute.xlu0 %221 }
  0x84   : > { %229 = vst.msk [vmem:[#allocation2 + $0x8] sm:$0xf0] %vm228_vm1, %v222_v7 }
  0x87   : > { %v249_v8 = vpop.permute.xlu1 %248  ;;  %v220_v9 = vpop.permute.xlu0 %219 }
  0x88   : > { %255 = vst.msk [vmem:[#allocation2 + $0x18] sm:$0xf0] %vm228_vm1, %v249_v8  ;;  %v224_v10 = vsel %vm223_vm2, %v220_v9, %v222_v7  ;;  %vm499_vm2 = vcmask 572864  }
  0x89   : > { %227 = vst [vmem:[#allocation2] sm:$0xf0] %v224_v10 }
  0x8b   : > { %v236_v11 = vpop.permute.xlu1 %235  ;;  %v247_v12 = vpop.permute.xlu0 %246  ;;  %v323_v20 = vld [vmem:[#allocation2 + $0x8] sm:$0xff] }
  0x8c   : > { %v238_v13 = vsel %vm237_vm3, %v234_v6, %v236_v11  ;;  %242 = vst.msk [vmem:[#allocation2 + $0x18] sm:$0xf] %vm214_vm0, %v236_v11  ;;  %v251_v14 = vsel %vm250_vm4, %v247_v12, %v249_v8  ;;  %vm518_vm3 = vcmask 687664   ;;  %vm592_vm4 = vcmask 97280  }
  0x8d   : > { %241 = vst [vmem:[#allocation2 + $0x10] sm:$0xf] %v238_v13  ;;  %254 = vst [vmem:[#allocation2 + $0x10] sm:$0xf0] %v251_v14 }
  0x8f   : > { %v262_v15 = vpop.permute.xlu1 %261  ;;  %v260_v16 = vpop.permute.xlu0 %259 }
  0x90   : > { %268 = vst.msk [vmem:[#allocation2 + $0x28] sm:$0xf] %vm214_vm0, %v262_v15  ;;  %v264_v17 = vsel %vm263_vm5, %v260_v16, %v262_v15  ;;  %v322_v24 = vld [vmem:[#allocation2] sm:$0xff]  ;;  %vm609_vm5 = vcmask 212064  }
  0x91   : > { %267 = vst [vmem:[#allocation2 + $0x20] sm:$0xf] %v264_v17 }
  0x93   : > { %v275_v18 = vpop.permute.xlu1 %274  ;;  %v273_v19 = vpop.permute.xlu0 %272  ;;  %v325_v21 = vld [vmem:[#allocation2 + $0x18] sm:$0xff] }
  0x94   : > { %281 = vst.msk [vmem:[#allocation2 + $0x28] sm:$0xf0] %vm228_vm1, %v275_v18  ;;  %v277_v22 = vsel %vm276_vm6, %v273_v19, %v275_v18  ;;  %v789_v23 = vpack.c.bf16 %v325_v21, %v323_v20  ;;  %v324_v25 = vld [vmem:[#allocation2 + $0x10] sm:$0xff]  ;;  %vm537_vm6 = vcmask 802464  }
  0x95   : > { %280 = vst [vmem:[#allocation2 + $0x20] sm:$0xf0] %v277_v22  ;;  %v791_v26 = vpack.c.bf16 %v324_v25, %v322_v24 }
  0x96   : > { %790 = vmatprep.subr.bf16.mxu0 %v789_v23 }
  0x97   : > { %v288_v27 = vpop.permute.xlu1 %287  ;;  %v286_v28 = vpop.permute.xlu0 %285  ;;  %792 = vmatpush1.bf16.msra.mxu0 %v791_v26 }
  0x98   : > { %294 = vst.msk [vmem:[#allocation2 + $0x38] sm:$0xf] %vm214_vm0, %v288_v27  ;;  %v290_v29 = vsel %vm289_vm7, %v286_v28, %v288_v27  ;;  %vm556_vm7 = vcmask 917264  }
  0x99   : > { %293 = vst [vmem:[#allocation2 + $0x30] sm:$0xf] %v290_v29 }
  0x9b   : > { %v301_v30 = vpop.permute.xlu1 %300  ;;  %v299_v31 = vpop.permute.xlu0 %298  ;;  %v327_v36 = vld [vmem:[#allocation2 + $0x28] sm:$0xff] }
  0x9c   : > { %307 = vst.msk [vmem:[#allocation2 + $0x38] sm:$0xf0] %vm228_vm1, %v301_v30  ;;  %v303_v32 = vsel %vm302_vm8, %v299_v31, %v301_v30  ;;  %v326_v39 = vld [vmem:[#allocation2 + $0x20] sm:$0xff]  ;;  %vm480_vm1 = vcmask 458064   ;;  %vm576_vm8 = vcmask 1032064  }
  0x9d   : > { %306 = vst [vmem:[#allocation2 + $0x30] sm:$0xf0] %v303_v32 }
  0x9f   : > { %v314_v33 = vpop.permute.xlu1 %313  ;;  %v312_v34 = vpop.permute.xlu0 %311 }
  0xa0   : > { %320 = vst.msk [vmem:[#allocation2 + $0x48] sm:$0xf] %vm214_vm0, %v314_v33  ;;  %v316_v35 = vsel %vm315_vm9, %v312_v34, %v314_v33  ;;  %vm461_vm0 = vcmask 343264   ;;  %vm590_vm9 = vcmask 1048560  }
  0xa1   : > { %319 = vst [vmem:[#allocation2 + $0x40] sm:$0xf] %v316_v35 }
  0xa3   : > { %v329_v37 = vld [vmem:[#allocation2 + $0x38] sm:$0xff] }
  0xa4   : > { %v793_v38 = vpack.c.bf16 %v329_v37, %v327_v36  ;;  %v328_v40 = vld [vmem:[#allocation2 + $0x30] sm:$0xff] }
  0xa5   : > { %v795_v41 = vpack.c.bf16 %v328_v40, %v326_v39 }
  0xa6   : > { %794 = vmatprep.subr.bf16.mxu0 %v793_v38 }
  0xa7   : > { %796 = vmatpush1.bf16.msra.mxu0 %v795_v41  ;;  %v331_v42 = vld [vmem:[#allocation2 + $0x48] sm:$0xf] }
  0xa8   : > { %782 = vmatprep.subr.msk.mxu0 %vm342_vm10, %v331_v42  ;;  %v330_v43 = vld [vmem:[#allocation2 + $0x40] sm:$0xf] }
  0xab   : > { %783 = vmatpush1.msk.msra.mxu0 %vm342_vm10, %v330_v43  ;;  %vm628_vm10 = vcmask 326864  }
  0xac   : > { %784 = vmatmul.mubr.msk.f32.vlgmr.msra.gmra.mrb[0].mxu0 %vm338_vm11, %v321_v44  ;;  %vm647_vm11 = vcmask 441664  }
  0xb0   : > { %v336_v45 = vpop.permute.xlu0 %335 }
 0x17f   : > { %v415_v46 = vpop.f32.mrb[0].mxu0 }
 0x180   : > { %v416_v47 = vadd.f32 %v415_v46, %v336_v45  ;;  %v417_v48 = vpop.f32.mrb[1].mxu0 }
 0x181   : > { %v418_v51 = vadd.f32 %v417_v48, %v336_v45 }
 0x182   : > { %vm420_vm12 = vcmp.gt.f32.partialorder %v416_v47, 0.0  ;;  %v422_v49 = vmul.f32 0.01, %v416_v47 }
 0x183   : > { %v423_v52 = vmul.f32 0.01, %v418_v51  ;;  %vm421_vm14 = vcmp.gt.f32.partialorder %v418_v51, 0.0 }
 0x184   : > { %v424_v50 = vsel %vm420_vm12, %v416_v47, %v422_v49  ;;  %vm682_vm12 = vcmask 7168  }
 0x185   : > { %443 = vrot.lane.b32.xlu0 %v424_v50, %s843_s23  ;;  %438 = vrot.lane.b32.xlu1 %v424_v50, %s841_s21  ;;  %427 = vst.msk [vmem:[%s934_s10] sm:$0xff] %vm426_vm13, %v424_v50  ;;  %v943_v53 = vsel %vm421_vm14, %v418_v51, %v423_v52  ;;  %s858_s21 = smov 48   ;;  %v432_v54 = vmul.f32 %v424_v50, %v424_v50  ;;  %v428_v55 = vsel %vm426_vm13, %v424_v50, 0.0  ;;  %vm666_vm14 = vcmask 556464  }
 0x186   : > { %v578_v56 = vsel %vm426_vm13, %v943_v53, 0.0  ;;  %v964_v58 = vmul.f32 %v943_v53, %v943_v53 }
 0x187   : > { %v433_v57 = vsel %vm426_vm13, %v432_v54, 0.0 }
 0x188   : > { %v583_v5 = vsel %vm426_vm13, %v964_v58, 0.0 }
 0x189   : > { %463 = vrot.lane.b32.xlu0 %v424_v50, %s846_s26  ;;  %458 = vrot.lane.b32.xlu1 %v424_v50, %s851_s11 }
 0x18d   : > { %482 = vrot.lane.b32.xlu0 %v424_v50, %s852_s12  ;;  %477 = vrot.lane.b32.xlu1 %v424_v50, %s853_s13 }
 0x191   : > { %501 = vrot.lane.b32.xlu0 %v424_v50, %s854_s14  ;;  %496 = vrot.lane.b32.xlu1 %v424_v50, %s855_s18 }
 0x195   : > { %539 = vrot.lane.b32.xlu0 %v424_v50, %s856_s19  ;;  %515 = vrot.lane.b32.xlu1 %v424_v50, %s857_s20 }
 0x199   : > { %587 = vrot.lane.b32.xlu0 %v943_v53, %s845_s25  ;;  %520 = vrot.lane.b32.xlu1 %v424_v50, %s858_s21  ;;  %s864_s25 = smov 104  }
 0x19d   : > { %606 = vrot.lane.b32.xlu0 %v943_v53, %s859_s22  ;;  %534 = vrot.lane.b32.xlu1 %v424_v50, %s860_s24 }
 0x1a1   : > { %611 = vrot.lane.b32.xlu0 %v943_v53, %s846_s26  ;;  %553 = vrot.lane.b32.xlu1 %v424_v50, %s861_s27 }
 0x1a5   : > { %558 = vrot.lane.b32.xlu1 %v424_v50, %s862_s28  ;;  %451 = vrot.lane.b32.xlu0 %v432_v54, %s843_s23 }
 0x1a9   : > { %470 = vrot.lane.b32.xlu0 %v432_v54, %s846_s26 }
 0x1ad   : > { %489 = vrot.lane.b32.xlu0 %v432_v54, %s852_s12 }
 0x1b1   : > { %508 = vrot.lane.b32.xlu0 %v432_v54, %s854_s14 }
 0x1b5   : > { %546 = vrot.lane.b32.xlu0 %v432_v54, %s856_s19 }
 0x1c9   : > { %429 = vadd.xlane.f32.xlu1 %v428_v55 }
 0x1d4   : > { %579 = vadd.xlane.f32.xlu0 %v578_v56 }
 0x1d8   : > { %434 = vadd.xlane.f32.xlu0 %v433_v57 }
 0x1da   : > { %573 = vrot.lane.b32.xlu1 %v943_v53, %s843_s23 }
 0x1de   : > { %527 = vrot.lane.b32.xlu1 %v432_v54, %s858_s21 }
 0x1e2   : > { %565 = vrot.lane.b32.xlu1 %v432_v54, %s862_s28 }
 0x1e6   : > { %599 = vrot.lane.b32.xlu1 %v964_v58, %s843_s23  ;;  %s863_s23 = smov 106  }
 0x1f7   : > { %v444_v59 = vpop.permute.xlu0 %443  ;;  %v439_v60 = vpop.permute.xlu1 %438 }
 0x1f8   : > { %442 = vst.msk [vmem:[%s934_s10] sm:$0xff] %vm441_vm15, %v439_v60  ;;  %v446_v9 = vsel %vm426_vm13, %v444_v59, 0.0 }
 0x1fb   : > { %v464_v61 = vpop.permute.xlu0 %463  ;;  %v459_v62 = vpop.permute.xlu1 %458 }
 0x1fc   : > { %462 = vst.msk [vmem:[%s934_s10] sm:$0xff] %vm461_vm0, %v459_v62  ;;  %v466_v12 = vsel %vm426_vm13, %v464_v61, 0.0 }
 0x1ff   : > { %v483_v63 = vpop.permute.xlu0 %482  ;;  %v478_v0 = vpop.permute.xlu1 %477 }
 0x200   : > { %481 = vst.msk [vmem:[%s934_s10] sm:$0xff] %vm480_vm1, %v478_v0  ;;  %v485_v14 = vsel %vm426_vm13, %v483_v63, 0.0 }
 0x203   : > { %v502_v1 = vpop.permute.xlu0 %501  ;;  %v497_v2 = vpop.permute.xlu1 %496 }
 0x204   : > { %500 = vst.msk [vmem:[%s934_s10] sm:$0xff] %vm499_vm2, %v497_v2  ;;  %v504_v17 = vsel %vm426_vm13, %v502_v1, 0.0 }
 0x207   : > { %v540_v3 = vpop.permute.xlu0 %539  ;;  %v516_v4 = vpop.permute.xlu1 %515 }
 0x208   : > { %519 = vst.msk [vmem:[%s934_s10] sm:$0xff] %vm518_vm3, %v516_v4  ;;  %v542_v18 = vsel %vm426_vm13, %v540_v3, 0.0 }
 0x20a   : > { %584 = vadd.xlane.f32.xlu1 %v583_v5 }
 0x20b   : > { %v588_v6 = vpop.permute.xlu0 %587  ;;  %v521_v7 = vpop.permute.xlu1 %520 }
 0x20c   : > { %593 = vst.msk [vmem:[%s934_s10 + $0x8] sm:$0xff] %vm592_vm4, %v588_v6  ;;  %v523_v8 = vsel %vm426_vm13, %v521_v7, 0.0 }
 0x20d   : > { %524 = vadd.xlane.f32.xlu0 %v523_v8 }
 0x20e   : > { %447 = vadd.xlane.f32.xlu1 %v446_v9 }
 0x20f   : > { %v607_v10 = vpop.permute.xlu0 %606  ;;  %v535_v11 = vpop.permute.xlu1 %534 }
 0x210   : > { %610 = vst.msk [vmem:[%s934_s10 + $0x8] sm:$0xff] %vm609_vm5, %v607_v10 }
 0x211   : > { %538 = vst.msk [vmem:[%s934_s10] sm:$0xff] %vm537_vm6, %v535_v11 }
 0x212   : > { %467 = vadd.xlane.f32.xlu1 %v466_v12 }
 0x213   : > { %v554_v13 = vpop.permute.xlu1 %553  ;;  %v612_v19 = vpop.permute.xlu0 %611 }
 0x214   : > { %557 = vst.msk [vmem:[%s934_s10] sm:$0xff] %vm556_vm7, %v554_v13  ;;  %v614_v39 = vsel %vm426_vm13, %v612_v19, 0.0 }
 0x216   : > { %486 = vadd.xlane.f32.xlu1 %v485_v14 }
 0x217   : > { %v559_v15 = vpop.permute.xlu1 %558  ;;  %v452_v20 = vpop.permute.xlu0 %451 }
 0x218   : > { %v561_v16 = vsel %vm426_vm13, %v559_v15, 0.0  ;;  %v454_v26 = vsel %vm426_vm13, %v452_v20, 0.0 }
 0x219   : > { %562 = vadd.xlane.f32.xlu0 %v561_v16 }
 0x21a   : > { %505 = vadd.xlane.f32.xlu1 %v504_v17 }
 0x21b   : > { %v471_v24 = vpop.permute.xlu0 %470 }
 0x21c   : > { %v473_v29 = vsel %vm426_vm13, %v471_v24, 0.0 }
 0x21e   : > { %543 = vadd.xlane.f32.xlu1 %v542_v18 }
 0x21f   : > { %v490_v27 = vpop.permute.xlu0 %489 }
 0x220   : > { %v492_v31 = vsel %vm426_vm13, %v490_v27, 0.0 }
 0x223   : > { %v509_v33 = vpop.permute.xlu0 %508 }
 0x224   : > { %v511_v34 = vsel %vm426_vm13, %v509_v33, 0.0 }
 0x227   : > { %v547_v36 = vpop.permute.xlu0 %546 }
 0x228   : > { %v549_v37 = vsel %vm426_vm13, %v547_v36, 0.0 }
 0x22f   : > { %618 = vrot.lane.b32.xlu1 %v964_v58, %s846_s26  ;;  %s865_s26 = smov 102  }
 0x256   : > { %v430_v21 = vpop.xlane.xlu1 %429 }
 0x25a   : > { %v574_v22 = vpop.permute.xlu1 %573 }
 0x25b   : > { %577 = vst.msk [vmem:[%s934_s10] sm:$0xff] %vm576_vm8, %v574_v22  ;;  %v594_v23 = vsel %vm426_vm13, %v574_v22, 0.0 }
 0x25c   : > { %591 = vst.msk [vmem:[%s934_s10] sm:$0xff] %vm590_vm9, %v588_v6  ;;  %595 = vadd.xlane.f32.xlu0 %v594_v23 }
 0x25e   : > { %v528_v25 = vpop.permute.xlu1 %527 }
 0x25f   : > { %v530_v35 = vsel %vm426_vm13, %v528_v25, 0.0 }
 0x260   : > { %455 = vadd.xlane.f32.xlu0 %v454_v26 }
 0x261   : > { %v580_v43 = vpop.xlane.xlu0 %579 }
 0x262   : > { %v566_v28 = vpop.permute.xlu1 %565 }
 0x263   : > { %v568_v38 = vsel %vm426_vm13, %v566_v28, 0.0 }
 0x264   : > { %474 = vadd.xlane.f32.xlu0 %v473_v29 }
 0x265   : > { %v435_v48 = vpop.xlane.xlu0 %434 }
 0x266   : > { %v600_v30 = vpop.permute.xlu1 %599 }
 0x267   : > { %v602_v32 = vsel %vm426_vm13, %v600_v30, 0.0 }
 0x268   : > { %493 = vadd.xlane.f32.xlu0 %v492_v31  ;;  %603 = vadd.xlane.f32.xlu1 %v602_v32 }
 0x26c   : > { %512 = vadd.xlane.f32.xlu0 %v511_v34 }
 0x270   : > { %531 = vadd.xlane.f32.xlu0 %v530_v35 }
 0x274   : > { %550 = vadd.xlane.f32.xlu0 %v549_v37 }
 0x278   : > { %569 = vadd.xlane.f32.xlu0 %v568_v38 }
 0x27c   : > { %615 = vadd.xlane.f32.xlu0 %v614_v39 }
 0x292   : > { %625 = vrot.lane.b32.xlu0 %v943_v53, %s863_s23 }
 0x296   : > { %630 = vrot.lane.b32.xlu0 %v943_v53, %s852_s12 }
 0x297   : > { %v585_v40 = vpop.xlane.xlu1 %584 }
 0x29a   : > { %v525_v51 = vpop.xlane.xlu0 %524 }
 0x29b   : > { %v448_v41 = vpop.xlane.xlu1 %447 }
 0x29c   : > { %v449_v42 = vadd.f32 %v448_v41, %v430_v21 }
 0x29f   : > { %v468_v44 = vpop.xlane.xlu1 %467 }
 0x2a0   : > { %v469_v45 = vadd.f32 %v468_v44, %v449_v42 }
 0x2a3   : > { %v487_v46 = vpop.xlane.xlu1 %486 }
 0x2a4   : > { %v488_v47 = vadd.f32 %v487_v46, %v469_v45 }
 0x2a6   : > { %v563_v56 = vpop.xlane.xlu0 %562 }
 0x2a7   : > { %v506_v49 = vpop.xlane.xlu1 %505 }
 0x2a8   : > { %v507_v50 = vadd.f32 %v506_v49, %v488_v47 }
 0x2aa   : > { %v526_v52 = vadd.f32 %v525_v51, %v507_v50 }
 0x2ab   : > { %v544_v54 = vpop.xlane.xlu1 %543 }
 0x2ac   : > { %v545_v55 = vadd.f32 %v544_v54, %v526_v52 }
 0x2ae   : > { %v564_v57 = vadd.f32 %v563_v56, %v545_v55 }
 0x2af   : > { %v619_v59 = vpop.permute.xlu1 %618 }
 0x2b0   : > { %v621_v60 = vsel %vm426_vm13, %v619_v59, 0.0  ;;  %v581_v61 = vadd.f32 %v580_v43, %v564_v57 }
 0x2b1   : > { %622 = vadd.xlane.f32.xlu1 %v621_v60 }
 0x2c2   : > { %637 = vrot.lane.b32.xlu1 %v964_v58, %s852_s12 }
 0x2c6   : > { %649 = vrot.lane.b32.xlu1 %v943_v53, %s854_s14 }
 0x2ca   : > { %656 = vrot.lane.b32.xlu1 %v964_v58, %s854_s14 }
 0x2ce   : > { %668 = vrot.lane.b32.xlu1 %v943_v53, %s858_s21 }
 0x2e9   : > { %v596_v62 = vpop.xlane.xlu0 %595 }
 0x2ea   : > { %v597_v63 = vadd.f32 %v596_v62, %v581_v61 }
 0x2ed   : > { %v456_v0 = vpop.xlane.xlu0 %455 }
 0x2ee   : > { %v457_v1 = vadd.f32 %v456_v0, %v435_v48 }
 0x2f1   : > { %v475_v2 = vpop.xlane.xlu0 %474 }
 0x2f2   : > { %v476_v3 = vadd.f32 %v475_v2, %v457_v1 }
 0x2f5   : > { %v494_v4 = vpop.xlane.xlu0 %493  ;;  %v604_v15 = vpop.xlane.xlu1 %603 }
 0x2f6   : > { %v495_v5 = vadd.f32 %v494_v4, %v476_v3 }
 0x2f9   : > { %v513_v6 = vpop.xlane.xlu0 %512 }
 0x2fa   : > { %v514_v7 = vadd.f32 %v513_v6, %v495_v5 }
 0x2fd   : > { %v532_v8 = vpop.xlane.xlu0 %531 }
 0x2fe   : > { %v533_v9 = vadd.f32 %v532_v8, %v514_v7 }
 0x301   : > { %v551_v10 = vpop.xlane.xlu0 %550 }
 0x302   : > { %v552_v11 = vadd.f32 %v551_v10, %v533_v9 }
 0x305   : > { %v570_v12 = vpop.xlane.xlu0 %569 }
 0x306   : > { %v571_v13 = vadd.f32 %v570_v12, %v552_v11 }
 0x308   : > { %v586_v14 = vadd.f32 %v585_v40, %v571_v13 }
 0x309   : > { %v616_v16 = vpop.xlane.xlu0 %615 }
 0x30a   : > { %v617_v17 = vadd.f32 %v616_v16, %v597_v63  ;;  %v605_v18 = vadd.f32 %v604_v15, %v586_v14 }
 0x30d   : > { %v626_v19 = vpop.permute.xlu0 %625 }
 0x30e   : > { %629 = vst.msk [vmem:[%s934_s10 + $0x8] sm:$0xff] %vm628_vm10, %v626_v19 }
 0x311   : > { %v631_v20 = vpop.permute.xlu0 %630 }
 0x312   : > { %v633_v21 = vsel %vm426_vm13, %v631_v20, 0.0 }
 0x313   : > { %634 = vadd.xlane.f32.xlu0 %v633_v21 }
 0x329   : > { %675 = vrot.lane.b32.xlu0 %v964_v58, %s858_s21 }
 0x32d   : > { %644 = vrot.lane.b32.xlu0 %v943_v53, %s864_s25 }
 0x33e   : > { %v623_v22 = vpop.xlane.xlu1 %622 }
 0x33f   : > { %v624_v23 = vadd.f32 %v623_v22, %v605_v18 }
 0x342   : > { %v638_v24 = vpop.permute.xlu1 %637 }
 0x343   : > { %v640_v25 = vsel %vm426_vm13, %v638_v24, 0.0 }
 0x344   : > { %641 = vadd.xlane.f32.xlu1 %v640_v25 }
 0x346   : > { %v650_v26 = vpop.permute.xlu1 %649 }
 0x347   : > { %v652_v28 = vsel %vm426_vm13, %v650_v26, 0.0 }
 0x34a   : > { %v657_v27 = vpop.permute.xlu1 %656 }
 0x34b   : > { %v659_v29 = vsel %vm426_vm13, %v657_v27, 0.0 }
 0x34c   : > { %653 = vadd.xlane.f32.xlu0 %v652_v28  ;;  %660 = vadd.xlane.f32.xlu1 %v659_v29 }
 0x34e   : > { %v669_v30 = vpop.permute.xlu1 %668 }
 0x34f   : > { %v671_v58 = vsel %vm426_vm13, %v669_v30, 0.0 }
 0x350   : > { %672 = vadd.xlane.f32.xlu1 %v671_v58 }
 0x3a0   : > { %v635_v31 = vpop.xlane.xlu0 %634 }
 0x3a1   : > { %v636_v39 = vadd.f32 %v635_v31, %v617_v17 }
 0x3a4   : > { %v676_v32 = vpop.permute.xlu0 %675 }
 0x3a5   : > { %v678_v33 = vsel %vm426_vm13, %v676_v32, 0.0  ;;  %vm684_vm13 = vcmask 15368  }
 0x3a6   : > { %679 = vadd.xlane.f32.xlu1 %v678_v33 }
 0x3a8   : > { %v645_v34 = vpop.permute.xlu0 %644 }
 0x3a9   : > { %648 = vst.msk [vmem:[%s934_s10 + $0x8] sm:$0xff] %vm647_vm11, %v645_v34 }
 0x3b7   : > { %663 = vrot.lane.b32.xlu1 %v943_v53, %s865_s26 }
 0x3d1   : > { %v642_v35 = vpop.xlane.xlu1 %641 }
 0x3d2   : > { %v643_v36 = vadd.f32 %v642_v35, %v624_v23 }
 0x3d9   : > { %v654_v37 = vpop.xlane.xlu0 %653  ;;  %v661_v38 = vpop.xlane.xlu1 %660 }
 0x3da   : > { %v662_v40 = vadd.f32 %v661_v38, %v643_v36  ;;  %v655_v41 = vadd.f32 %v654_v37, %v636_v39 }
 0x3dd   : > { %v673_v42 = vpop.xlane.xlu1 %672 }
 0x3de   : > { %v674_v43 = vadd.f32 %v673_v42, %v655_v41 }
 0x3e0   : > { %683 = vst.msk [vmem:[%s208_s5] sm:$0xff] %vm682_vm12, %v674_v43 }
 0x433   : > { %v680_v44 = vpop.xlane.xlu1 %679 }
 0x434   : > { %v681_v53 = vadd.f32 %v680_v44, %v662_v40 }
 0x436   : > { %685 = vst.msk [vmem:[%s208_s5] sm:$0xff] %vm684_vm13, %v681_v53 }
 0x437   : > { %v664_v45 = vpop.permute.xlu1 %663 }
 0x438   : > { %667 = vst.msk [vmem:[%s934_s10 + $0x8] sm:$0xff] %vm666_vm14, %v664_v45 }
 0x439 PF: > { %s15_s15 = sadd.s32 1, %s839_s15  }
 0x43a   : > { %p12_p4 = scmp.ge.s32.totalorder %s15_s15, 4  }
 0x43c   :  { %14 = sbr.rel (!%p12_p4) target bundleno = 1 (0x1), region = 74 }

</bundles_post_ra>
